<compile_context>
chip_gen: v7x
topology: tpu7x:2x2x1
jax: 0.10.0
libtpu: 0.0.40
codegen_flags: <defaults>
</compile_context>

<pallas_src>
import functools

import jax
import jax.numpy as jnp
from jax import lax
from jax.experimental import pallas as pl
from jax.experimental.pallas import tpu as pltpu


# ---------------------------------------------------------------------------
# Tiling constants.
#
# The kernel runs at ~16 flops/byte with ni/nh/no = 12/32/8, i.e. it is purely
# HBM/DMA bound on every generation, so the levers are (a) tiles big enough to
# amortize per-grid-step pipeline/DMA-setup overhead and (b) enough grid steps
# that v7x's two TensorCores both stay busy with >= 2 pipelined steps each.
#
# VMEM accounting at _BLOCK_ROWS = 8192 (f32; the 12/8-wide feature dims pad
# to 128 lanes in VMEM): input tile 4 MiB + output tile 4 MiB, double-buffered
# = 16 MiB, plus a few similarly sized intermediates inside the kernel body
# (~8-12 MiB peak).  Comfortably under _VMEM_LIMIT and v7x's 64 MiB physical.
_BLOCK_ROWS = 8192      # row tile for the flattened [M, ni] path
_BLOCK_SEQ = 8192       # seq tile for the channel-first path (multiple of 128)
_MIN_GRID_STEPS = 4     # >= 2 pipelined steps per TensorCore on v7x megacore
_VMEM_LIMIT = 48 << 20  # above the 32 MiB scoped default, below v7x's 64 MiB


def _silu_f32(h):
    # SiLU = h * sigmoid(h), exact, in f32.  exp() runs on the EUP; the divide
    # stays on the VALU but the kernel is DMA-bound so it is hidden.  (The
    # approx-EUP reciprocal would violate the 1e-5 reference tolerance.)
    return h * (1.0 / (1.0 + jnp.exp(-h)))


def _encoder_rows_kernel(x_ref, w1_ref, b1_ref, w2_ref, b2_ref, o_ref):
    # x_ref: [TM, ni]  w1_ref: [nh, ni]  b1_ref: [1, nh]
    # w2_ref: [no, nh] b2_ref: [1, no]   o_ref: [TM, no]
    x = x_ref[...]  # native dtype straight to the MXU
    h = lax.dot_general(x, w1_ref[...], (((1,), (1,)), ((), ())),
                        preferred_element_type=jnp.float32)
    h = h + b1_ref[...]                      # (TM, nh) + (1, nh)
    h = _silu_f32(h)                         # Dropout (eval) = identity
    h = h.astype(w2_ref.dtype)
    o = lax.dot_general(h, w2_ref[...], (((1,), (1,)), ((), ())),
                        preferred_element_type=jnp.float32)
    o = o + b2_ref[...]
    o_ref[...] = o.astype(o_ref.dtype)


def _encoder_chan_kernel(x_ref, w1_ref, b1_ref, w2_ref, b2_ref, o_ref):
    # Channel-first layout, no transposes anywhere:
    # x_ref: [ni, TS]  w1_ref: [nh, ni]  b1_ref: [nh, 1]
    # w2_ref: [no, nh] b2_ref: [no, 1]   o_ref: [no, TS]
    x = x_ref[...]
    h = jnp.dot(w1_ref[...], x, preferred_element_type=jnp.float32)   # (nh, TS)
    h = h + b1_ref[...]                      # lane broadcast of (nh, 1)
    h = _silu_f32(h)                         # Dropout (eval) = identity
    h = h.astype(w2_ref.dtype)
    o = jnp.dot(w2_ref[...], h, preferred_element_type=jnp.float32)   # (no, TS)
    o = o + b2_ref[...]
    o_ref[...] = o.astype(o_ref.dtype)


def _pick_row_tile(M):
    """Row tile: multiple of 32 (covers f32/bf16/int8 sublane packing), at
    most _BLOCK_ROWS, and small enough to give >= _MIN_GRID_STEPS grid steps
    whenever M allows it.  Falls back to the full extent for tiny M."""
    if M < _MIN_GRID_STEPS * 32:
        return M
    return min(_BLOCK_ROWS, max(32, (M // _MIN_GRID_STEPS) // 32 * 32))


def _pick_seq_tile(S, B):
    """Seq tile (lane dim): multiple of 128 or the full extent, at most
    _BLOCK_SEQ, chosen so that B * ceil(S/TS) >= _MIN_GRID_STEPS when
    feasible."""
    need = -(-_MIN_GRID_STEPS // B)          # ceil(MIN_STEPS / B) seq blocks
    if need <= 1:
        return S if S <= _BLOCK_SEQ else _BLOCK_SEQ
    if S < need * 128:
        return S                             # too short to split on lanes
    return min(_BLOCK_SEQ, max(128, (S // need) // 128 * 128))


def _cost_estimate(M, ni, nh, no, itemsize):
    flops = 2 * M * (ni * nh + nh * no)
    transcendentals = M * nh                 # the exp() in SiLU
    bytes_accessed = itemsize * (M * (ni + no) + nh * ni + nh + no * nh + no)
    return pl.CostEstimate(flops=flops, transcendentals=transcendentals,
                           bytes_accessed=bytes_accessed)


def encoder_forward(x, w1, b1, w2, b2, *, transpose=False):
    """Forward pass matching the PyTorch `encoder` module (eval mode).

    Args:
      x:  [B, S, ni] if transpose=False, else [B, ni, S]
      w1: [nh, ni], b1: [nh]   (nn.Linear(ni, nh) convention)
      w2: [no, nh], b2: [no]   (nn.Linear(nh, no) convention)
    Returns:
      [B, S, no] if transpose=False, else [B, no, S]
    """
    nh, ni = w1.shape
    no = w2.shape[0]
    itemsize = jnp.dtype(x.dtype).itemsize

    if transpose:
        B, ni_x, S = x.shape
        assert ni_x == ni
        TS = _pick_seq_tile(S, B)
        return pl.pallas_call(
            _encoder_chan_kernel,
            out_shape=jax.ShapeDtypeStruct((B, no, S), x.dtype),
            grid=(B, pl.cdiv(S, TS)),
            in_specs=[
                pl.BlockSpec((None, ni, TS), lambda b, s: (b, 0, s)),
                pl.BlockSpec((nh, ni), lambda b, s: (0, 0)),
                pl.BlockSpec((nh, 1), lambda b, s: (0, 0)),
                pl.BlockSpec((no, nh), lambda b, s: (0, 0)),
                pl.BlockSpec((no, 1), lambda b, s: (0, 0)),
            ],
            out_specs=pl.BlockSpec((None, no, TS), lambda b, s: (b, 0, s)),
            compiler_params=pltpu.CompilerParams(
                dimension_semantics=("parallel", "parallel"),
                vmem_limit_bytes=_VMEM_LIMIT),
            cost_estimate=_cost_estimate(B * S, ni, nh, no, itemsize),
        )(x, w1, b1.reshape(nh, 1), w2, b2.reshape(no, 1))

    B, S, ni_x = x.shape
    assert ni_x == ni
    M = B * S
    TM = _pick_row_tile(M)
    x2d = x.reshape(M, ni)
    out2d = pl.pallas_call(
        _encoder_rows_kernel,
        out_shape=jax.ShapeDtypeStruct((M, no), x.dtype),
        grid=(pl.cdiv(M, TM),),
        in_specs=[
            pl.BlockSpec((TM, ni), lambda i: (i, 0)),
            pl.BlockSpec((nh, ni), lambda i: (0, 0)),
            pl.BlockSpec((1, nh), lambda i: (0, 0)),
            pl.BlockSpec((no, nh), lambda i: (0, 0)),
            pl.BlockSpec((1, no), lambda i: (0, 0)),
        ],
        # NOTE(perf): no=8 < 128 lanes -> masked partial stores + 32 B VMEM-side
        # DMA segments on this path (input side: 48 B segments).  The HBM side
        # of both DMAs is fully contiguous (the block spans the full minor
        # dim).  The zero-extra-traffic fix is the lane-dense (M//16, 128) /
        # (M//32, 384) reinterpretation -- deliberately not adopted here, see
        # the TODO(synk) at the top of the file.
        out_specs=pl.BlockSpec((TM, no), lambda i: (i, 0)),
        compiler_params=pltpu.CompilerParams(
            dimension_semantics=("parallel",),
            vmem_limit_bytes=_VMEM_LIMIT),
        cost_estimate=_cost_estimate(M, ni, nh, no, itemsize),
    )(x2d, w1, b1.reshape(1, nh), w2, b2.reshape(1, no))
    return out2d.reshape(B, S, no)


def _reference_forward(x, w1, b1, w2, b2, *, transpose=False):
    """Pure-JAX reference of the PyTorch forward (eval mode)."""
    if transpose:
        x = jnp.transpose(x, (0, 2, 1))
    h = jnp.einsum("bsi,hi->bsh", x, w1) + b1
    h = h * jax.nn.sigmoid(h)
    o = jnp.einsum("bsh,oh->bso", h, w2) + b2
    if transpose:
        o = jnp.transpose(o, (0, 2, 1))
    return o


if __name__ == "__main__":
    # Module hyperparameters (small, consistent with encoder(ni, nh, no, d)).
    ni, nh, no = 12, 32, 8

    key = jax.random.PRNGKey(0)
    k_w1, k_b1, k_w2, k_b2, k_x = jax.random.split(key, 5)

    bound1 = 1.0 / (ni ** 0.5)
    bound2 = 1.0 / (nh ** 0.5)
    w1 = jax.random.uniform(k_w1, (nh, ni), minval=-bound1, maxval=bound1,
                            dtype=jnp.float32)
    b1 = jax.random.uniform(k_b1, (nh,), minval=-bound1, maxval=bound1,
                            dtype=jnp.float32)
    w2 = jax.random.uniform(k_w2, (no, nh), minval=-bound2, maxval=bound2,
                            dtype=jnp.float32)
    b2 = jax.random.uniform(k_b2, (no,), minval=-bound2, maxval=bound2,
                            dtype=jnp.float32)

    fwd_f = jax.jit(functools.partial(encoder_forward, transpose=False))
    fwd_t = jax.jit(functools.partial(encoder_forward, transpose=True))

    # Canonical small shapes plus ragged multi-block cases that exercise the
    # tiled grids (masked tail blocks) on both paths.
    cases = [
        (False, (2, 8, ni)),     # [B, S, ni], single block
        (False, (2, 300, ni)),   # rows path: grid of 5, ragged tail
        (True,  (2, ni, 8)),     # [B, ni, S], single seq block
        (True,  (3, ni, 300)),   # channel path: 3x3 grid, ragged tail
    ]
    for idx, (transpose, shape) in enumerate(cases):
        x = jax.random.normal(jax.random.fold_in(k_x, idx), shape,
                              dtype=jnp.float32)
        fwd = fwd_t if transpose else fwd_f
        out = jax.block_until_ready(fwd(x, w1, b1, w2, b2))
        ref = _reference_forward(x, w1, b1, w2, b2, transpose=transpose)
        assert out.shape == ref.shape, (out.shape, ref.shape)
        assert jnp.allclose(out, ref, atol=1e-5, rtol=1e-4), \
            f"mismatch in case {idx} (transpose={transpose}, shape={shape})"

    print("KERNEL_OK")
</pallas_src>

<mosaic_0001>
module attributes {stable_mosaic.version = 11 : i64} {
  func.func @_encoder_rows_kernel(%arg0: i32, %arg1: memref<16x12xf32, #tpu.memory_space<vmem>>, %arg2: memref<32x12xf32, #tpu.memory_space<vmem>>, %arg3: memref<1x32xf32, #tpu.memory_space<vmem>>, %arg4: memref<8x32xf32, #tpu.memory_space<vmem>>, %arg5: memref<1x8xf32, #tpu.memory_space<vmem>>, %arg6: memref<16x8xf32, #tpu.memory_space<vmem>>) attributes {dimension_semantics = [#tpu.dimension_semantics<parallel>], iteration_bounds = array<i64: 1>, scalar_prefetch = 0 : i64, scratch_operands = 0 : i64, tpu.core_type = #tpu.core_type<tc>, window_params = [{transform_indices = @transform_0, window_bounds = array<i64: 16, 12>}, {pipeline_mode = #tpu.pipeline_mode<synchronous>, transform_indices = @transform_1, window_bounds = array<i64: 32, 12>}, {pipeline_mode = #tpu.pipeline_mode<synchronous>, transform_indices = @transform_2, window_bounds = array<i64: 1, 32>}, {pipeline_mode = #tpu.pipeline_mode<synchronous>, transform_indices = @transform_3, window_bounds = array<i64: 8, 32>}, {pipeline_mode = #tpu.pipeline_mode<synchronous>, transform_indices = @transform_4, window_bounds = array<i64: 1, 8>}, {transform_indices = @transform_5, window_bounds = array<i64: 16, 8>}]} {
    %c0 = arith.constant 0 : index
    %c0_0 = arith.constant 0 : index
    %0 = vector.load %arg1[%c0, %c0_0] : memref<16x12xf32, #tpu.memory_space<vmem>>, vector<16x12xf32>
    %c0_1 = arith.constant 0 : index
    %c0_2 = arith.constant 0 : index
    %1 = vector.load %arg2[%c0_1, %c0_2] : memref<32x12xf32, #tpu.memory_space<vmem>>, vector<32x12xf32>
    %cst = arith.constant dense<0.000000e+00> : vector<16x32xf32>
    %2 = tpu.matmul %0, %1, %cst {dimension_numbers = #tpu.dot_dimension_numbers<[1], [1], [0], [0], [0, 0, 1, 0], [], []>} : vector<16x12xf32>, vector<32x12xf32>, vector<16x32xf32> -> vector<16x32xf32>
    %c0_3 = arith.constant 0 : index
    %c0_4 = arith.constant 0 : index
    %3 = vector.load %arg3[%c0_3, %c0_4] : memref<1x32xf32, #tpu.memory_space<vmem>>, vector<1x32xf32>
    %4 = vector.broadcast %3 : vector<1x32xf32> to vector<16x32xf32>
    %5 = arith.addf %2, %4 : vector<16x32xf32>
    %cst_5 = arith.constant 0.000000e+00 : f32
    %6 = vector.broadcast %cst_5 : f32 to vector<16x32xf32>
    %7 = arith.subf %6, %5 : vector<16x32xf32>
    %8 = math.exp %7 : vector<16x32xf32>
    %cst_6 = arith.constant 1.000000e+00 : f32
    %9 = vector.broadcast %cst_6 : f32 to vector<16x32xf32>
    %10 = arith.addf %9, %8 : vector<16x32xf32>
    %cst_7 = arith.constant 1.000000e+00 : f32
    %11 = vector.broadcast %cst_7 : f32 to vector<16x32xf32>
    %12 = arith.divf %11, %10 : vector<16x32xf32>
    %13 = arith.mulf %5, %12 : vector<16x32xf32>
    %c0_8 = arith.constant 0 : index
    %c0_9 = arith.constant 0 : index
    %14 = vector.load %arg4[%c0_8, %c0_9] : memref<8x32xf32, #tpu.memory_space<vmem>>, vector<8x32xf32>
    %cst_10 = arith.constant dense<0.000000e+00> : vector<16x8xf32>
    %15 = tpu.matmul %13, %14, %cst_10 {dimension_numbers = #tpu.dot_dimension_numbers<[1], [1], [0], [0], [0, 0, 1, 0], [], []>} : vector<16x32xf32>, vector<8x32xf32>, vector<16x8xf32> -> vector<16x8xf32>
    %c0_11 = arith.constant 0 : index
    %c0_12 = arith.constant 0 : index
    %16 = vector.load %arg5[%c0_11, %c0_12] : memref<1x8xf32, #tpu.memory_space<vmem>>, vector<1x8xf32>
    %17 = vector.broadcast %16 : vector<1x8xf32> to vector<16x8xf32>
    %18 = arith.addf %15, %17 : vector<16x8xf32>
    %c0_13 = arith.constant 0 : index
    %c0_14 = arith.constant 0 : index
    %19 = vector.load %arg6[%c0_13, %c0_14] : memref<16x8xf32, #tpu.memory_space<vmem>>, vector<16x8xf32>
    tpu.vector_store %arg6[%c0_13, %c0_14], %18 {strides = array<i32>} : memref<16x8xf32, #tpu.memory_space<vmem>>, vector<16x8xf32>,
    return
  }
  func.func @transform_0(%arg0: i32) -> (i32, i32) {
    %c0_i32 = arith.constant 0 : i32
    %c0_i32_0 = arith.constant 0 : i32
    return %arg0, %c0_i32 : i32, i32
  }
  func.func @transform_1(%arg0: i32) -> (i32, i32) {
    %c0_i32 = arith.constant 0 : i32
    %c0_i32_0 = arith.constant 0 : i32
    %c0_i32_1 = arith.constant 0 : i32
    return %c0_i32, %c0_i32_0 : i32, i32
  }
  func.func @transform_2(%arg0: i32) -> (i32, i32) {
    %c0_i32 = arith.constant 0 : i32
    %c0_i32_0 = arith.constant 0 : i32
    %c0_i32_1 = arith.constant 0 : i32
    return %c0_i32, %c0_i32_0 : i32, i32
  }
  func.func @transform_3(%arg0: i32) -> (i32, i32) {
    %c0_i32 = arith.constant 0 : i32
    %c0_i32_0 = arith.constant 0 : i32
    %c0_i32_1 = arith.constant 0 : i32
    return %c0_i32, %c0_i32_0 : i32, i32
  }
  func.func @transform_4(%arg0: i32) -> (i32, i32) {
    %c0_i32 = arith.constant 0 : i32
    %c0_i32_0 = arith.constant 0 : i32
    %c0_i32_1 = arith.constant 0 : i32
    return %c0_i32, %c0_i32_0 : i32, i32
  }
  func.func @transform_5(%arg0: i32) -> (i32, i32) {
    %c0_i32 = arith.constant 0 : i32
    %c0_i32_0 = arith.constant 0 : i32
    return %arg0, %c0_i32 : i32, i32
  }
}

</mosaic_0001>

<bundles_post_ra>
// kernel: encoder_forward.1
= control target key start
LH: loop header
LB: loop body
LE: loop exit
PB: predicated region body
PF: predicated region fallthrough
CT: control target
= control target key end

     0   :  { %vm34_vm0 = vcmask 97280   ;;  %s413_s0 = inlined_call_operand.vmem [shape: f32[16,12], index: 0, kind: input, shape index: {}]   ;;  %s414_s1 = inlined_call_operand.vmem [shape: f32[32,12], index: 1, kind: input, shape index: {}]   ;;  %s415_s2 = inlined_call_operand.vmem [shape: f32[1,32], index: 2, kind: input, shape index: {}]   ;;  %s416_s3 = inlined_call_operand.vmem [shape: f32[8,32], index: 3, kind: input, shape index: {}]   ;;  %s417_s4 = inlined_call_operand.vmem [shape: f32[1,8], index: 4, kind: input, shape index: {}]   ;;  %s418_s5 = inlined_call_operand.hbm [shape: f32[16,8], index: 5, kind: output, shape index: {}]  }
   0x1   :  { %v23_v0 = vld [vmem:[%s414_s1] sm:$0xff]  ;;  %v24_v1 = vld [vmem:[%s414_s1 + $0x8] sm:$0xff]  ;;  %v25_v2 = vld [vmem:[%s414_s1 + $0x10] sm:$0xff] }
   0x2   :  { %v290_v3 = vpack.c.bf16 %v24_v1, %v23_v0  ;;  %vm291_vm1 = vmpackc.low %vm34_vm0, %vm34_vm0  ;;  %v26_v4 = vld [vmem:[%s414_s1 + $0x18] sm:$0xff]  ;;  %v21_v5 = vld [vmem:[%s413_s0] sm:$0xff] }
   0x3   :  { %v296_v6 = vpack.c.bf16 %v26_v4, %v25_v2  ;;  %282 = vmatprep.mubr.msk.f32.mxu0 %vm34_vm0, %v21_v5 }
   0x4   :  { %10 = vsyncpa [#allocation3], 0  ;;  %292 = vmatprep.subr.msk.bf16.mxu0 %vm291_vm1, %v290_v3  ;;  %v22_v7 = vld [vmem:[%s413_s0 + $0x8] sm:$0xff]  ;;  %v142_v8 = vld [vmem:[%s416_s3] sm:$0xff]  ;;  %vm150_vm2 = vcmask 261120   ;;  %s337_s3 = smov [#allocation2]  }
   0x5   :  { %295 = vmatpush3.bf16.xpose.msk.msra.mxu0 %vm291_vm1, %v290_v3  ;;  %285 = vmatprep.subr.msk.mxu1 %vm150_vm2, %v142_v8  ;;  %v254_v9 = vld [vmem:[%s415_s2] ss:$0 sm:$0xff]  ;;  %s243_s8 = sshll.u32 %s337_s3, 4  ;;  %vm235_vm3 = vcmask 64512   ;;  %s244_s8 = int_to_ptr.vmem [resolvable:$true] %s243_s8 }
   0x6   :  { %298 = vmatprep.subr.msk.bf16.mxu0 %vm291_vm1, %v296_v6  ;;  %286 = vmatpush3.xpose.msk.msra.mxu1 %vm150_vm2, %v142_v8  ;;  %v261_v26 = vld [vmem:[%s417_s4] ss:$0 sm:$0xff]  ;;  %s313_s9 = scalar_lea.vmem %s244_s8, 256  ;;  %p318_p1 = scmp.lt.s32.totalorder %s244_s8, %s244_s8 }
   0x7   :  { %p314_p0 = scmp.ne.s32.totalorder %s244_s8, %s313_s9  ;;  %p319_p2 = scmp.lt.s32.totalorder %s313_s9, %s313_s9 }
   0x9   :  { %p320_p3 = por %p319_p2, %p318_p1 }
   0xb   :  { %p321_p4 = pnand %p320_p3, %p314_p0 }
   0xd   :  { %301 = vmatpush3.bf16.xpose.msk.msra.mxu0 %vm291_vm1, %v296_v6 }
  0x14   :  { %283 = vmatmul.mubr.msk.f32.vlgmr.msra.gmra.mrb[0].mxu0 %vm34_vm0, %v22_v7 }
  0xe7   :  { %v284_v10 = vpop.f32.mrb[0].mxu0 }
  0xe8   :  { %v125_v11 = vadd.f32 %v284_v10, %v254_v9  ;;  %v119_v12 = vpop.f32.mrb[1].mxu0 }
  0xe9   :  { %v120_v13 = vadd.f32 %v254_v9, %v119_v12 }
  0xea   :  { %v129_v14 = vsub.f32 0.0, %v125_v11 }
  0xeb   :  { %v128_v15 = vsub.f32 0.0, %v120_v13 }
  0xec   :  { %v132_v16 = vmul.f32 1.442695, %v129_v14 }
  0xed   :  { %v130_v17 = vmul.f32 1.442695, %v128_v15 }
  0xee   :  { %305 = vpow2.f32 %v132_v16 }
  0xef   :  { %307 = vpow2.f32 %v130_v17 }
  0xf8   :  { %v306_v18 = vpop.eup %305 }
  0xf9   :  { %v308_v19 = vpop.eup %307  ;;  %v135_v20 = vadd.f32 1.0, %v306_v18 }
  0xfa   :  { %v134_v21 = vadd.f32 1.0, %v308_v19 }
  0xfb   :  { %309 = vrcp.f32 %v135_v20 }
  0xfc   :  { %311 = vrcp.f32 %v134_v21 }
 0x105   :  { %v310_v22 = vpop.eup %309 }
 0x106   :  { %v312_v23 = vpop.eup %311  ;;  %v141_v25 = vmul.f32 %v310_v22, %v125_v11 }
 0x107   :  { %v140_v24 = vmul.f32 %v312_v23, %v120_v13 }
 0x109   :  { %287 = vmatprep.mubr.msk.f32.mxu1 %vm150_vm2, %v140_v24 }
 0x10a   :  { %288 = vmatmul.mubr.msk.f32.vlgmr.msra.gmra.mrb[0].mxu1 %vm150_vm2, %v141_v25 }
 0x1dd   :  { %v289_v27 = vpop.f32.mrb[0].mxu1 }
 0x1de   :  { %v232_v28 = vadd.f32 %v289_v27, %v261_v26  ;;  %v226_v29 = vpop.f32.mrb[1].mxu1 }
 0x1df   :  { %v227_v30 = vadd.f32 %v261_v26, %v226_v29 }
 0x1e0   :  { %237 = vst.msk [vmem:[#allocation2 + $0x8] sm:$0xff] %vm235_vm3, %v232_v28 }
 0x1e1   :  { %236 = vst.msk [vmem:[#allocation2] sm:$0xff] %vm235_vm3, %v227_v30 }
 0x1e2   :  { %324 = shalt.err (!%p321_p4)
}
 0x1e3   :  { %s325_s4 = scalar_lea.hbm %s418_s5, 256 }
 0x1e4   :  { %p326_p5 = scmp.ne.s32.totalorder %s418_s5, %s325_s4  ;;  %p329_p6 = scmp.lt.u32.totalorder %s325_s4, %s418_s5 }
 0x1e6   :  { %p331_p7 = pnand %p329_p6, %p326_p5 }
 0x1e8   :  { %334 = shalt.err (!%p331_p7)
}
 0x1e9   :  { %s338_s16 = smov 128   ;;  %s339_s17 = smov 8  }
 0x1ea   :  { %249 = dma.vmem_to_hbm [thread:$0]  %s244_s8, 256, %s418_s5, [#allocation3], %s338_s16, %s338_s16, %s339_s17  }
 0x1eb   :  { %335 = dma.done.wait [#allocation3], 256  }
 0x1ec   :  { %336 = vsyncadd [#allocation3], 4294967040 }
 0x1ed   :  { %253 = vsyncpa [#allocation3], 1 }

</bundles_post_ra>
